<compile_context>
chip_gen: v6e
topology: v6e:2x2x1
jax: 0.10.0
libtpu: 0.0.40
codegen_flags: <defaults>
</compile_context>

<pallas_src>
import jax
import jax.numpy as jnp
from jax import lax
from jax.experimental import pallas as pl
from jax.experimental.pallas import tpu as pltpu


def make_cross_attention_kernel(heads: int, dim_head: int, scale: float,
                                compute_dtype):
    def kernel(x_ref, ctx_ref, wq_ref, wk_ref, wv_ref, wo_ref, b_ref, out_ref):
        # x_ref:  (bb, N, dim)          ctx_ref: (bb, M, cdim)
        # wq_ref: (heads, dim, d)       wk_ref/wv_ref: (heads, cdim, d)
        # wo_ref: (heads, d, dim)       b_ref: (1, dim)
        bb, N, dim = x_ref.shape
        _, M, cdim = ctx_ref.shape

        # Fold batch into the matmul rows for the projections
        # (leading-dim merge, tile-aligned -> free).
        x2 = x_ref[...].reshape(bb * N, dim).astype(compute_dtype)
        c2 = ctx_ref[...].reshape(bb * M, cdim).astype(compute_dtype)

        y = jnp.zeros((bb * N, dim), jnp.float32)
        # Static unroll over heads.  Every per-head access below indexes a
        # LEADING axis (weight stacks / batch); nothing slices the lane dim.
        for h in range(heads):
            q = jnp.dot(x2, wq_ref[h].astype(compute_dtype),
                        preferred_element_type=jnp.float32)            # (bb*N, d)
            k = jnp.dot(c2, wk_ref[h].astype(compute_dtype),
                        preferred_element_type=jnp.float32)            # (bb*M, d)
            v = jnp.dot(c2, wv_ref[h].astype(compute_dtype),
                        preferred_element_type=jnp.float32)            # (bb*M, d)

            q3 = q.reshape(bb, N, dim_head).astype(compute_dtype)
            k3 = k.reshape(bb, M, dim_head).astype(compute_dtype)
            v3 = v.reshape(bb, M, dim_head).astype(compute_dtype)

            # Scores: contract on the LAST dim of both operands (no kh.T).
            s = lax.dot_general(q3, k3, (((2,), (2,)), ((0,), (0,))),
                                preferred_element_type=jnp.float32) * scale  # (bb,N,M)

            # Numerically stable softmax, kept in f32 (v5e has no bf16 VPU/EUP).
            s = s - jnp.max(s, axis=-1, keepdims=True)
            e = jnp.exp(s)
            attn = e * pl.reciprocal(jnp.sum(e, axis=-1, keepdims=True),
                                     approx=True)
            # dropout(p=0.0) == identity
            # TODO(synk): for long context (large M), tile M with an online
            # softmax accumulator instead of materializing (N, M) (v7x: 64 MiB VMEM).

            o = lax.dot_general(attn.astype(compute_dtype), v3,
                                (((2,), (1,)), ((0,), (0,))),
                                preferred_element_type=jnp.float32)     # (bb, N, d)

            # Fold "concat heads" into the output projection: accumulate the
            # per-head contribution o_h @ Wout_h (rows h*d:(h+1)*d of Wout).
            y = y + jnp.dot(o.reshape(bb * N, dim_head).astype(compute_dtype),
                            wo_ref[h].astype(compute_dtype),
                            preferred_element_type=jnp.float32)          # (bb*N, dim)

        y = y + b_ref[...].astype(jnp.float32)                           # bias broadcast
        out_ref[...] = y.reshape(bb, N, dim).astype(out_ref.dtype)

    return kernel


def cross_attention_pallas(x, context, wq_t, wkv_t, wout_t, bout,
                           heads: int, dim_head: int,
                           compute_dtype=jnp.bfloat16, batch_block=None):
    """x: (B, N, dim), context: (B, M, cdim). Returns (B, N, dim)."""
    B, N, dim = x.shape
    _, M, cdim = context.shape
    inner_dim = heads * dim_head
    scale = float(dim_head) ** -0.5

    # One-time weight re-arrangement in the wrapper (plain XLA), so the kernel
    # never slices along the lane dimension:
    wk_t = wkv_t[:, :inner_dim]                                         # (cdim, inner)
    wv_t = wkv_t[:, inner_dim:]                                         # (cdim, inner)
    wq_h = wq_t.reshape(dim, heads, dim_head).transpose(1, 0, 2)        # (H, dim, d)
    wk_h = wk_t.reshape(cdim, heads, dim_head).transpose(1, 0, 2)       # (H, cdim, d)
    wv_h = wv_t.reshape(cdim, heads, dim_head).transpose(1, 0, 2)       # (H, cdim, d)
    wo_h = wout_t.reshape(heads, dim_head, dim)                         # (H, d, dim)
    b2 = bout.reshape(1, dim)

    bb = B if batch_block is None else min(int(batch_block), B)
    kernel = make_cross_attention_kernel(heads, dim_head, scale, compute_dtype)

    return pl.pallas_call(
        kernel,
        out_shape=jax.ShapeDtypeStruct((B, N, dim), x.dtype),
        grid=(pl.cdiv(B, bb),),
        in_specs=[
            pl.BlockSpec((bb, N, dim), lambda b: (b, 0, 0)),
            pl.BlockSpec((bb, M, cdim), lambda b: (b, 0, 0)),
            pl.BlockSpec((heads, dim, dim_head), lambda b: (0, 0, 0)),
            pl.BlockSpec((heads, cdim, dim_head), lambda b: (0, 0, 0)),
            pl.BlockSpec((heads, cdim, dim_head), lambda b: (0, 0, 0)),
            pl.BlockSpec((heads, dim_head, dim), lambda b: (0, 0, 0)),
            pl.BlockSpec((1, dim), lambda b: (0, 0)),
        ],
        out_specs=pl.BlockSpec((bb, N, dim), lambda b: (b, 0, 0)),
        compiler_params=pltpu.CompilerParams(
            dimension_semantics=("parallel",),
        ),
    )(x, context, wq_h, wk_h, wv_h, wo_h, b2)


def cross_attention_ref(x, context, wq_t, wkv_t, wout_t, bout,
                        heads: int, dim_head: int):
    """Plain-JAX reference matching the PyTorch module semantics."""
    B, N, dim = x.shape
    inner = heads * dim_head
    scale = float(dim_head) ** -0.5
    q = x @ wq_t                                # (B, N, inner)
    kv = context @ wkv_t                        # (B, M, 2*inner)
    k, v = kv[..., :inner], kv[..., inner:]

    def split_heads(t):
        Bz, L, _ = t.shape
        return t.reshape(Bz, L, heads, dim_head).transpose(0, 2, 1, 3)

    qh, kh, vh = split_heads(q), split_heads(k), split_heads(v)
    dots = jnp.einsum('bhnd,bhmd->bhnm', qh, kh) * scale
    attn = jax.nn.softmax(dots, axis=-1)
    out = jnp.einsum('bhnm,bhmd->bhnd', attn, vh)
    out = out.transpose(0, 2, 1, 3).reshape(B, N, inner)
    return out @ wout_t + bout


if __name__ == "__main__":
    # Small, module-consistent shapes.
    B, N, M = 2, 8, 8
    dim = 32
    context_dim = 32          # default(context_dim, dim)
    heads = 4
    dim_head = 8
    inner_dim = heads * dim_head   # 32

    key = jax.random.PRNGKey(0)
    kx, kc, kq, kkv, kwo, kbo = jax.random.split(key, 6)

    x = jax.random.normal(kx, (B, N, dim), dtype=jnp.float32)
    context = jax.random.normal(kc, (B, M, context_dim), dtype=jnp.float32)

    # Deterministic parameter init (nn.Linear-like scale). Stored pre-transposed
    # as [in_features, out_features].
    wq_t = jax.random.normal(kq, (dim, inner_dim), dtype=jnp.float32) * 0.05
    wkv_t = jax.random.normal(kkv, (context_dim, 2 * inner_dim), dtype=jnp.float32) * 0.05
    wout_t = jax.random.normal(kwo, (inner_dim, dim), dtype=jnp.float32) * 0.05
    bout = jax.random.normal(kbo, (dim,), dtype=jnp.float32) * 0.05

    y_ref = cross_attention_ref(x, context, wq_t, wkv_t, wout_t, bout,
                                heads=heads, dim_head=dim_head)

    # Exact-precision path (f32 MXU operands) -> tight check of the restructured math.
    y_f32 = cross_attention_pallas(x, context, wq_t, wkv_t, wout_t, bout,
                                   heads=heads, dim_head=dim_head,
                                   compute_dtype=jnp.float32)
    y_f32 = jax.block_until_ready(y_f32)
    assert y_f32.shape == (B, N, dim)
    assert jnp.allclose(y_f32, y_ref, atol=1e-3, rtol=1e-3), "f32 path mismatch vs reference"

    # Default bf16-MXU-operand path (v6e/v7x-friendly) -> relaxed tolerance.
    y_bf16 = cross_attention_pallas(x, context, wq_t, wkv_t, wout_t, bout,
                                    heads=heads, dim_head=dim_head,
                                    compute_dtype=jnp.bfloat16)
    y_bf16 = jax.block_until_ready(y_bf16)
    assert y_bf16.shape == (B, N, dim)
    assert jnp.allclose(y_bf16, y_ref, atol=2e-2, rtol=2e-2), "bf16 path mismatch vs reference"

    print("KERNEL_OK")
</pallas_src>

<mosaic_0001>
module attributes {stable_mosaic.version = 11 : i64} {
  func.func @kernel(%arg0: i32, %arg1: memref<2x8x32xf32, #tpu.memory_space<vmem>>, %arg2: memref<2x8x32xf32, #tpu.memory_space<vmem>>, %arg3: memref<4x32x8xf32, #tpu.memory_space<vmem>>, %arg4: memref<4x32x8xf32, #tpu.memory_space<vmem>>, %arg5: memref<4x32x8xf32, #tpu.memory_space<vmem>>, %arg6: memref<4x8x32xf32, #tpu.memory_space<vmem>>, %arg7: memref<1x32xf32, #tpu.memory_space<vmem>>, %arg8: memref<2x8x32xf32, #tpu.memory_space<vmem>>) attributes {dimension_semantics = [#tpu.dimension_semantics<parallel>], iteration_bounds = array<i64: 1>, scalar_prefetch = 0 : i64, scratch_operands = 0 : i64, tpu.core_type = #tpu.core_type<tc>, window_params = [{transform_indices = @transform_0, window_bounds = array<i64: 2, 8, 32>}, {transform_indices = @transform_1, window_bounds = array<i64: 2, 8, 32>}, {pipeline_mode = #tpu.pipeline_mode<synchronous>, transform_indices = @transform_2, window_bounds = array<i64: 4, 32, 8>}, {pipeline_mode = #tpu.pipeline_mode<synchronous>, transform_indices = @transform_3, window_bounds = array<i64: 4, 32, 8>}, {pipeline_mode = #tpu.pipeline_mode<synchronous>, transform_indices = @transform_4, window_bounds = array<i64: 4, 32, 8>}, {pipeline_mode = #tpu.pipeline_mode<synchronous>, transform_indices = @transform_5, window_bounds = array<i64: 4, 8, 32>}, {pipeline_mode = #tpu.pipeline_mode<synchronous>, transform_indices = @transform_6, window_bounds = array<i64: 1, 32>}, {transform_indices = @transform_7, window_bounds = array<i64: 2, 8, 32>}]} {
    %c0 = arith.constant 0 : index
    %c0_0 = arith.constant 0 : index
    %c0_1 = arith.constant 0 : index
    %0 = vector.load %arg1[%c0, %c0_0, %c0_1] : memref<2x8x32xf32, #tpu.memory_space<vmem>>, vector<2x8x32xf32>
    %1 = vector.shape_cast %0 : vector<2x8x32xf32> to vector<16x32xf32>
    %c0_2 = arith.constant 0 : index
    %c0_3 = arith.constant 0 : index
    %c0_4 = arith.constant 0 : index
    %2 = vector.load %arg2[%c0_2, %c0_3, %c0_4] : memref<2x8x32xf32, #tpu.memory_space<vmem>>, vector<2x8x32xf32>
    %3 = vector.shape_cast %2 : vector<2x8x32xf32> to vector<16x32xf32>
    %cst = arith.constant 0.000000e+00 : f32
    %4 = vector.broadcast %cst : f32 to vector<16x32xf32>
    %c0_5 = arith.constant 0 : index
    %c0_6 = arith.constant 0 : index
    %c0_7 = arith.constant 0 : index
    %5 = vector.load %arg3[%c0_5, %c0_6, %c0_7] : memref<4x32x8xf32, #tpu.memory_space<vmem>>, vector<1x32x8xf32>
    %6 = vector.shape_cast %5 : vector<1x32x8xf32> to vector<32x8xf32>
    %cst_8 = arith.constant dense<0.000000e+00> : vector<16x8xf32>
    %7 = tpu.matmul %1, %6, %cst_8 {dimension_numbers = #tpu.dot_dimension_numbers<[1], [0], [0], [1], [0, 0, 1, 1], [], []>} : vector<16x32xf32>, vector<32x8xf32>, vector<16x8xf32> -> vector<16x8xf32>
    %c0_9 = arith.constant 0 : index
    %c0_10 = arith.constant 0 : index
    %c0_11 = arith.constant 0 : index
    %8 = vector.load %arg4[%c0_9, %c0_10, %c0_11] : memref<4x32x8xf32, #tpu.memory_space<vmem>>, vector<1x32x8xf32>
    %9 = vector.shape_cast %8 : vector<1x32x8xf32> to vector<32x8xf32>
    %cst_12 = arith.constant dense<0.000000e+00> : vector<16x8xf32>
    %10 = tpu.matmul %3, %9, %cst_12 {dimension_numbers = #tpu.dot_dimension_numbers<[1], [0], [0], [1], [0, 0, 1, 1], [], []>} : vector<16x32xf32>, vector<32x8xf32>, vector<16x8xf32> -> vector<16x8xf32>
    %c0_13 = arith.constant 0 : index
    %c0_14 = arith.constant 0 : index
    %c0_15 = arith.constant 0 : index
    %11 = vector.load %arg5[%c0_13, %c0_14, %c0_15] : memref<4x32x8xf32, #tpu.memory_space<vmem>>, vector<1x32x8xf32>
    %12 = vector.shape_cast %11 : vector<1x32x8xf32> to vector<32x8xf32>
    %cst_16 = arith.constant dense<0.000000e+00> : vector<16x8xf32>
    %13 = tpu.matmul %3, %12, %cst_16 {dimension_numbers = #tpu.dot_dimension_numbers<[1], [0], [0], [1], [0, 0, 1, 1], [], []>} : vector<16x32xf32>, vector<32x8xf32>, vector<16x8xf32> -> vector<16x8xf32>
    %14 = vector.shape_cast %7 : vector<16x8xf32> to vector<2x8x8xf32>
    %15 = vector.shape_cast %10 : vector<16x8xf32> to vector<2x8x8xf32>
    %16 = vector.shape_cast %13 : vector<16x8xf32> to vector<2x8x8xf32>
    %cst_17 = arith.constant dense<0.000000e+00> : vector<2x8x8xf32>
    %17 = tpu.matmul %14, %15, %cst_17 {dimension_numbers = #tpu.dot_dimension_numbers<[2], [2], [1], [1], [0, 0, 0, 1, 1, 1], [0], [0]>} : vector<2x8x8xf32>, vector<2x8x8xf32>, vector<2x8x8xf32> -> vector<2x8x8xf32>
    %cst_18 = arith.constant 0.353553385 : f32
    %18 = vector.broadcast %cst_18 : f32 to vector<2x8x8xf32>
    %19 = arith.mulf %17, %18 : vector<2x8x8xf32>
    %cst_19 = arith.constant dense<0xFF800000> : vector<2x8xf32>
    %20 = vector.multi_reduction <maximumf>, %19, %cst_19 [2] : vector<2x8x8xf32> to vector<2x8xf32>
    %21 = vector.shape_cast %20 : vector<2x8xf32> to vector<2x8x1xf32>
    %22 = vector.broadcast %21 : vector<2x8x1xf32> to vector<2x8x8xf32>
    %23 = arith.subf %19, %22 : vector<2x8x8xf32>
    %24 = math.exp %23 : vector<2x8x8xf32>
    %cst_20 = arith.constant dense<0.000000e+00> : vector<2x8xf32>
    %25 = vector.multi_reduction <add>, %24, %cst_20 [2] : vector<2x8x8xf32> to vector<2x8xf32>
    %26 = vector.shape_cast %25 : vector<2x8xf32> to vector<2x8x1xf32>
    %27 = tpu.reciprocal %26 {approx = true} : vector<2x8x1xf32> -> vector<2x8x1xf32>
    %28 = vector.broadcast %27 : vector<2x8x1xf32> to vector<2x8x8xf32>
    %29 = arith.mulf %24, %28 : vector<2x8x8xf32>
    %cst_21 = arith.constant dense<0.000000e+00> : vector<2x8x8xf32>
    %30 = tpu.matmul %29, %16, %cst_21 {dimension_numbers = #tpu.dot_dimension_numbers<[2], [1], [1], [2], [0, 0, 0, 1, 1, 2], [0], [0]>} : vector<2x8x8xf32>, vector<2x8x8xf32>, vector<2x8x8xf32> -> vector<2x8x8xf32>
    %31 = vector.shape_cast %30 : vector<2x8x8xf32> to vector<16x8xf32>
    %c0_22 = arith.constant 0 : index
    %c0_23 = arith.constant 0 : index
    %c0_24 = arith.constant 0 : index
    %32 = vector.load %arg6[%c0_22, %c0_23, %c0_24] : memref<4x8x32xf32, #tpu.memory_space<vmem>>, vector<1x8x32xf32>
    %33 = vector.shape_cast %32 : vector<1x8x32xf32> to vector<8x32xf32>
    %cst_25 = arith.constant dense<0.000000e+00> : vector<16x32xf32>
    %34 = tpu.matmul %31, %33, %cst_25 {dimension_numbers = #tpu.dot_dimension_numbers<[1], [0], [0], [1], [0, 0, 1, 1], [], []>} : vector<16x8xf32>, vector<8x32xf32>, vector<16x32xf32> -> vector<16x32xf32>
    %35 = arith.addf %4, %34 : vector<16x32xf32>
    %c1 = arith.constant 1 : index
    %c0_26 = arith.constant 0 : index
    %c0_27 = arith.constant 0 : index
    %36 = vector.load %arg3[%c1, %c0_26, %c0_27] : memref<4x32x8xf32, #tpu.memory_space<vmem>>, vector<1x32x8xf32>
    %37 = vector.shape_cast %36 : vector<1x32x8xf32> to vector<32x8xf32>
    %cst_28 = arith.constant dense<0.000000e+00> : vector<16x8xf32>
    %38 = tpu.matmul %1, %37, %cst_28 {dimension_numbers = #tpu.dot_dimension_numbers<[1], [0], [0], [1], [0, 0, 1, 1], [], []>} : vector<16x32xf32>, vector<32x8xf32>, vector<16x8xf32> -> vector<16x8xf32>
    %c1_29 = arith.constant 1 : index
    %c0_30 = arith.constant 0 : index
    %c0_31 = arith.constant 0 : index
    %39 = vector.load %arg4[%c1_29, %c0_30, %c0_31] : memref<4x32x8xf32, #tpu.memory_space<vmem>>, vector<1x32x8xf32>
    %40 = vector.shape_cast %39 : vector<1x32x8xf32> to vector<32x8xf32>
    %cst_32 = arith.constant dense<0.000000e+00> : vector<16x8xf32>
    %41 = tpu.matmul %3, %40, %cst_32 {dimension_numbers = #tpu.dot_dimension_numbers<[1], [0], [0], [1], [0, 0, 1, 1], [], []>} : vector<16x32xf32>, vector<32x8xf32>, vector<16x8xf32> -> vector<16x8xf32>
    %c1_33 = arith.constant 1 : index
    %c0_34 = arith.constant 0 : index
    %c0_35 = arith.constant 0 : index
    %42 = vector.load %arg5[%c1_33, %c0_34, %c0_35] : memref<4x32x8xf32, #tpu.memory_space<vmem>>, vector<1x32x8xf32>
    %43 = vector.shape_cast %42 : vector<1x32x8xf32> to vector<32x8xf32>
    %cst_36 = arith.constant dense<0.000000e+00> : vector<16x8xf32>
    %44 = tpu.matmul %3, %43, %cst_36 {dimension_numbers = #tpu.dot_dimension_numbers<[1], [0], [0], [1], [0, 0, 1, 1], [], []>} : vector<16x32xf32>, vector<32x8xf32>, vector<16x8xf32> -> vector<16x8xf32>
    %45 = vector.shape_cast %38 : vector<16x8xf32> to vector<2x8x8xf32>
    %46 = vector.shape_cast %41 : vector<16x8xf32> to vector<2x8x8xf32>
    %47 = vector.shape_cast %44 : vector<16x8xf32> to vector<2x8x8xf32>
    %cst_37 = arith.constant dense<0.000000e+00> : vector<2x8x8xf32>
    %48 = tpu.matmul %45, %46, %cst_37 {dimension_numbers = #tpu.dot_dimension_numbers<[2], [2], [1], [1], [0, 0, 0, 1, 1, 1], [0], [0]>} : vector<2x8x8xf32>, vector<2x8x8xf32>, vector<2x8x8xf32> -> vector<2x8x8xf32>
    %cst_38 = arith.constant 0.353553385 : f32
    %49 = vector.broadcast %cst_38 : f32 to vector<2x8x8xf32>
    %50 = arith.mulf %48, %49 : vector<2x8x8xf32>
    %cst_39 = arith.constant dense<0xFF800000> : vector<2x8xf32>
    %51 = vector.multi_reduction <maximumf>, %50, %cst_39 [2] : vector<2x8x8xf32> to vector<2x8xf32>
    %52 = vector.shape_cast %51 : vector<2x8xf32> to vector<2x8x1xf32>
    %53 = vector.broadcast %52 : vector<2x8x1xf32> to vector<2x8x8xf32>
    %54 = arith.subf %50, %53 : vector<2x8x8xf32>
    %55 = math.exp %54 : vector<2x8x8xf32>
    %cst_40 = arith.constant dense<0.000000e+00> : vector<2x8xf32>
    %56 = vector.multi_reduction <add>, %55, %cst_40 [2] : vector<2x8x8xf32> to vector<2x8xf32>
    %57 = vector.shape_cast %56 : vector<2x8xf32> to vector<2x8x1xf32>
    %58 = tpu.reciprocal %57 {approx = true} : vector<2x8x1xf32> -> vector<2x8x1xf32>
    %59 = vector.broadcast %58 : vector<2x8x1xf32> to vector<2x8x8xf32>
    %60 = arith.mulf %55, %59 : vector<2x8x8xf32>
    %cst_41 = arith.constant dense<0.000000e+00> : vector<2x8x8xf32>
    %61 = tpu.matmul %60, %47, %cst_41 {dimension_numbers = #tpu.dot_dimension_numbers<[2], [1], [1], [2], [0, 0, 0, 1, 1, 2], [0], [0]>} : vector<2x8x8xf32>, vector<2x8x8xf32>, vector<2x8x8xf32> -> vector<2x8x8xf32>
    %62 = vector.shape_cast %61 : vector<2x8x8xf32> to vector<16x8xf32>
    %c1_42 = arith.constant 1 : index
    %c0_43 = arith.constant 0 : index
    %c0_44 = arith.constant 0 : index
    %63 = vector.load %arg6[%c1_42, %c0_43, %c0_44] : memref<4x8x32xf32, #tpu.memory_space<vmem>>, vector<1x8x32xf32>
    %64 = vector.shape_cast %63 : vector<1x8x32xf32> to vector<8x32xf32>
    %cst_45 = arith.constant dense<0.000000e+00> : vector<16x32xf32>
    %65 = tpu.matmul %62, %64, %cst_45 {dimension_numbers = #tpu.dot_dimension_numbers<[1], [0], [0], [1], [0, 0, 1, 1], [], []>} : vector<16x8xf32>, vector<8x32xf32>, vector<16x32xf32> -> vector<16x32xf32>
    %66 = arith.addf %35, %65 : vector<16x32xf32>
    %c2 = arith.constant 2 : index
    %c0_46 = arith.constant 0 : index
    %c0_47 = arith.constant 0 : index
    %67 = vector.load %arg3[%c2, %c0_46, %c0_47] : memref<4x32x8xf32, #tpu.memory_space<vmem>>, vector<1x32x8xf32>
    %68 = vector.shape_cast %67 : vector<1x32x8xf32> to vector<32x8xf32>
    %cst_48 = arith.constant dense<0.000000e+00> : vector<16x8xf32>
    %69 = tpu.matmul %1, %68, %cst_48 {dimension_numbers = #tpu.dot_dimension_numbers<[1], [0], [0], [1], [0, 0, 1, 1], [], []>} : vector<16x32xf32>, vector<32x8xf32>, vector<16x8xf32> -> vector<16x8xf32>
    %c2_49 = arith.constant 2 : index
    %c0_50 = arith.constant 0 : index
    %c0_51 = arith.constant 0 : index
    %70 = vector.load %arg4[%c2_49, %c0_50, %c0_51] : memref<4x32x8xf32, #tpu.memory_space<vmem>>, vector<1x32x8xf32>
    %71 = vector.shape_cast %70 : vector<1x32x8xf32> to vector<32x8xf32>
    %cst_52 = arith.constant dense<0.000000e+00> : vector<16x8xf32>
    %72 = tpu.matmul %3, %71, %cst_52 {dimension_numbers = #tpu.dot_dimension_numbers<[1], [0], [0], [1], [0, 0, 1, 1], [], []>} : vector<16x32xf32>, vector<32x8xf32>, vector<16x8xf32> -> vector<16x8xf32>
    %c2_53 = arith.constant 2 : index
    %c0_54 = arith.constant 0 : index
    %c0_55 = arith.constant 0 : index
    %73 = vector.load %arg5[%c2_53, %c0_54, %c0_55] : memref<4x32x8xf32, #tpu.memory_space<vmem>>, vector<1x32x8xf32>
    %74 = vector.shape_cast %73 : vector<1x32x8xf32> to vector<32x8xf32>
    %cst_56 = arith.constant dense<0.000000e+00> : vector<16x8xf32>
    %75 = tpu.matmul %3, %74, %cst_56 {dimension_numbers = #tpu.dot_dimension_numbers<[1], [0], [0], [1], [0, 0, 1, 1], [], []>} : vector<16x32xf32>, vector<32x8xf32>, vector<16x8xf32> -> vector<16x8xf32>
    %76 = vector.shape_cast %69 : vector<16x8xf32> to vector<2x8x8xf32>
    %77 = vector.shape_cast %72 : vector<16x8xf32> to vector<2x8x8xf32>
    %78 = vector.shape_cast %75 : vector<16x8xf32> to vector<2x8x8xf32>
    %cst_57 = arith.constant dense<0.000000e+00> : vector<2x8x8xf32>
    %79 = tpu.matmul %76, %77, %cst_57 {dimension_numbers = #tpu.dot_dimension_numbers<[2], [2], [1], [1], [0, 0, 0, 1, 1, 1], [0], [0]>} : vector<2x8x8xf32>, vector<2x8x8xf32>, vector<2x8x8xf32> -> vector<2x8x8xf32>
    %cst_58 = arith.constant 0.353553385 : f32
    %80 = vector.broadcast %cst_58 : f32 to vector<2x8x8xf32>
    %81 = arith.mulf %79, %80 : vector<2x8x8xf32>
    %cst_59 = arith.constant dense<0xFF800000> : vector<2x8xf32>
    %82 = vector.multi_reduction <maximumf>, %81, %cst_59 [2] : vector<2x8x8xf32> to vector<2x8xf32>
    %83 = vector.shape_cast %82 : vector<2x8xf32> to vector<2x8x1xf32>
    %84 = vector.broadcast %83 : vector<2x8x1xf32> to vector<2x8x8xf32>
    %85 = arith.subf %81, %84 : vector<2x8x8xf32>
    %86 = math.exp %85 : vector<2x8x8xf32>
    %cst_60 = arith.constant dense<0.000000e+00> : vector<2x8xf32>
    %87 = vector.multi_reduction <add>, %86, %cst_60 [2] : vector<2x8x8xf32> to vector<2x8xf32>
    %88 = vector.shape_cast %87 : vector<2x8xf32> to vector<2x8x1xf32>
    %89 = tpu.reciprocal %88 {approx = true} : vector<2x8x1xf32> -> vector<2x8x1xf32>
    %90 = vector.broadcast %89 : vector<2x8x1xf32> to vector<2x8x8xf32>
    %91 = arith.mulf %86, %90 : vector<2x8x8xf32>
    %cst_61 = arith.constant dense<0.000000e+00> : vector<2x8x8xf32>
    %92 = tpu.matmul %91, %78, %cst_61 {dimension_numbers = #tpu.dot_dimension_numbers<[2], [1], [1], [2], [0, 0, 0, 1, 1, 2], [0], [0]>} : vector<2x8x8xf32>, vector<2x8x8xf32>, vector<2x8x8xf32> -> vector<2x8x8xf32>
    %93 = vector.shape_cast %92 : vector<2x8x8xf32> to vector<16x8xf32>
    %c2_62 = arith.constant 2 : index
    %c0_63 = arith.constant 0 : index
    %c0_64 = arith.constant 0 : index
    %94 = vector.load %arg6[%c2_62, %c0_63, %c0_64] : memref<4x8x32xf32, #tpu.memory_space<vmem>>, vector<1x8x32xf32>
    %95 = vector.shape_cast %94 : vector<1x8x32xf32> to vector<8x32xf32>
    %cst_65 = arith.constant dense<0.000000e+00> : vector<16x32xf32>
    %96 = tpu.matmul %93, %95, %cst_65 {dimension_numbers = #tpu.dot_dimension_numbers<[1], [0], [0], [1], [0, 0, 1, 1], [], []>} : vector<16x8xf32>, vector<8x32xf32>, vector<16x32xf32> -> vector<16x32xf32>
    %97 = arith.addf %66, %96 : vector<16x32xf32>
    %c3 = arith.constant 3 : index
    %c0_66 = arith.constant 0 : index
    %c0_67 = arith.constant 0 : index
    %98 = vector.load %arg3[%c3, %c0_66, %c0_67] : memref<4x32x8xf32, #tpu.memory_space<vmem>>, vector<1x32x8xf32>
    %99 = vector.shape_cast %98 : vector<1x32x8xf32> to vector<32x8xf32>
    %cst_68 = arith.constant dense<0.000000e+00> : vector<16x8xf32>
    %100 = tpu.matmul %1, %99, %cst_68 {dimension_numbers = #tpu.dot_dimension_numbers<[1], [0], [0], [1], [0, 0, 1, 1], [], []>} : vector<16x32xf32>, vector<32x8xf32>, vector<16x8xf32> -> vector<16x8xf32>
    %c3_69 = arith.constant 3 : index
    %c0_70 = arith.constant 0 : index
    %c0_71 = arith.constant 0 : index
    %101 = vector.load %arg4[%c3_69, %c0_70, %c0_71] : memref<4x32x8xf32, #tpu.memory_space<vmem>>, vector<1x32x8xf32>
    %102 = vector.shape_cast %101 : vector<1x32x8xf32> to vector<32x8xf32>
    %cst_72 = arith.constant dense<0.000000e+00> : vector<16x8xf32>
    %103 = tpu.matmul %3, %102, %cst_72 {dimension_numbers = #tpu.dot_dimension_numbers<[1], [0], [0], [1], [0, 0, 1, 1], [], []>} : vector<16x32xf32>, vector<32x8xf32>, vector<16x8xf32> -> vector<16x8xf32>
    %c3_73 = arith.constant 3 : index
    %c0_74 = arith.constant 0 : index
    %c0_75 = arith.constant 0 : index
    %104 = vector.load %arg5[%c3_73, %c0_74, %c0_75] : memref<4x32x8xf32, #tpu.memory_space<vmem>>, vector<1x32x8xf32>
    %105 = vector.shape_cast %104 : vector<1x32x8xf32> to vector<32x8xf32>
    %cst_76 = arith.constant dense<0.000000e+00> : vector<16x8xf32>
    %106 = tpu.matmul %3, %105, %cst_76 {dimension_numbers = #tpu.dot_dimension_numbers<[1], [0], [0], [1], [0, 0, 1, 1], [], []>} : vector<16x32xf32>, vector<32x8xf32>, vector<16x8xf32> -> vector<16x8xf32>
    %107 = vector.shape_cast %100 : vector<16x8xf32> to vector<2x8x8xf32>
    %108 = vector.shape_cast %103 : vector<16x8xf32> to vector<2x8x8xf32>
    %109 = vector.shape_cast %106 : vector<16x8xf32> to vector<2x8x8xf32>
    %cst_77 = arith.constant dense<0.000000e+00> : vector<2x8x8xf32>
    %110 = tpu.matmul %107, %108, %cst_77 {dimension_numbers = #tpu.dot_dimension_numbers<[2], [2], [1], [1], [0, 0, 0, 1, 1, 1], [0], [0]>} : vector<2x8x8xf32>, vector<2x8x8xf32>, vector<2x8x8xf32> -> vector<2x8x8xf32>
    %cst_78 = arith.constant 0.353553385 : f32
    %111 = vector.broadcast %cst_78 : f32 to vector<2x8x8xf32>
    %112 = arith.mulf %110, %111 : vector<2x8x8xf32>
    %cst_79 = arith.constant dense<0xFF800000> : vector<2x8xf32>
    %113 = vector.multi_reduction <maximumf>, %112, %cst_79 [2] : vector<2x8x8xf32> to vector<2x8xf32>
    %114 = vector.shape_cast %113 : vector<2x8xf32> to vector<2x8x1xf32>
    %115 = vector.broadcast %114 : vector<2x8x1xf32> to vector<2x8x8xf32>
    %116 = arith.subf %112, %115 : vector<2x8x8xf32>
    %117 = math.exp %116 : vector<2x8x8xf32>
    %cst_80 = arith.constant dense<0.000000e+00> : vector<2x8xf32>
    %118 = vector.multi_reduction <add>, %117, %cst_80 [2] : vector<2x8x8xf32> to vector<2x8xf32>
    %119 = vector.shape_cast %118 : vector<2x8xf32> to vector<2x8x1xf32>
    %120 = tpu.reciprocal %119 {approx = true} : vector<2x8x1xf32> -> vector<2x8x1xf32>
    %121 = vector.broadcast %120 : vector<2x8x1xf32> to vector<2x8x8xf32>
    %122 = arith.mulf %117, %121 : vector<2x8x8xf32>
    %cst_81 = arith.constant dense<0.000000e+00> : vector<2x8x8xf32>
    %123 = tpu.matmul %122, %109, %cst_81 {dimension_numbers = #tpu.dot_dimension_numbers<[2], [1], [1], [2], [0, 0, 0, 1, 1, 2], [0], [0]>} : vector<2x8x8xf32>, vector<2x8x8xf32>, vector<2x8x8xf32> -> vector<2x8x8xf32>
    %124 = vector.shape_cast %123 : vector<2x8x8xf32> to vector<16x8xf32>
    %c3_82 = arith.constant 3 : index
    %c0_83 = arith.constant 0 : index
    %c0_84 = arith.constant 0 : index
    %125 = vector.load %arg6[%c3_82, %c0_83, %c0_84] : memref<4x8x32xf32, #tpu.memory_space<vmem>>, vector<1x8x32xf32>
    %126 = vector.shape_cast %125 : vector<1x8x32xf32> to vector<8x32xf32>
    %cst_85 = arith.constant dense<0.000000e+00> : vector<16x32xf32>
    %127 = tpu.matmul %124, %126, %cst_85 {dimension_numbers = #tpu.dot_dimension_numbers<[1], [0], [0], [1], [0, 0, 1, 1], [], []>} : vector<16x8xf32>, vector<8x32xf32>, vector<16x32xf32> -> vector<16x32xf32>
    %128 = arith.addf %97, %127 : vector<16x32xf32>
    %c0_86 = arith.constant 0 : index
    %c0_87 = arith.constant 0 : index
    %129 = vector.load %arg7[%c0_86, %c0_87] : memref<1x32xf32, #tpu.memory_space<vmem>>, vector<1x32xf32>
    %130 = vector.broadcast %129 : vector<1x32xf32> to vector<16x32xf32>
    %131 = arith.addf %128, %130 : vector<16x32xf32>
    %132 = vector.shape_cast %131 : vector<16x32xf32> to vector<2x8x32xf32>
    %c0_88 = arith.constant 0 : index
    %c0_89 = arith.constant 0 : index
    %c0_90 = arith.constant 0 : index
    %133 = vector.load %arg8[%c0_88, %c0_89, %c0_90] : memref<2x8x32xf32, #tpu.memory_space<vmem>>, vector<2x8x32xf32>
    tpu.vector_store %arg8[%c0_88, %c0_89, %c0_90], %132 {strides = array<i32>} : memref<2x8x32xf32, #tpu.memory_space<vmem>>, vector<2x8x32xf32>,
    return
  }
  func.func @transform_0(%arg0: i32) -> (i32, i32, i32) {
    %c0_i32 = arith.constant 0 : i32
    %c0_i32_0 = arith.constant 0 : i32
    %c0_i32_1 = arith.constant 0 : i32
    return %arg0, %c0_i32, %c0_i32_0 : i32, i32, i32
  }
  func.func @transform_1(%arg0: i32) -> (i32, i32, i32) {
    %c0_i32 = arith.constant 0 : i32
    %c0_i32_0 = arith.constant 0 : i32
    %c0_i32_1 = arith.constant 0 : i32
    return %arg0, %c0_i32, %c0_i32_0 : i32, i32, i32
  }
  func.func @transform_2(%arg0: i32) -> (i32, i32, i32) {
    %c0_i32 = arith.constant 0 : i32
    %c0_i32_0 = arith.constant 0 : i32
    %c0_i32_1 = arith.constant 0 : i32
    %c0_i32_2 = arith.constant 0 : i32
    return %c0_i32, %c0_i32_0, %c0_i32_1 : i32, i32, i32
  }
  func.func @transform_3(%arg0: i32) -> (i32, i32, i32) {
    %c0_i32 = arith.constant 0 : i32
    %c0_i32_0 = arith.constant 0 : i32
    %c0_i32_1 = arith.constant 0 : i32
    %c0_i32_2 = arith.constant 0 : i32
    return %c0_i32, %c0_i32_0, %c0_i32_1 : i32, i32, i32
  }
  func.func @transform_4(%arg0: i32) -> (i32, i32, i32) {
    %c0_i32 = arith.constant 0 : i32
    %c0_i32_0 = arith.constant 0 : i32
    %c0_i32_1 = arith.constant 0 : i32
    %c0_i32_2 = arith.constant 0 : i32
    return %c0_i32, %c0_i32_0, %c0_i32_1 : i32, i32, i32
  }
  func.func @transform_5(%arg0: i32) -> (i32, i32, i32) {
    %c0_i32 = arith.constant 0 : i32
    %c0_i32_0 = arith.constant 0 : i32
    %c0_i32_1 = arith.constant 0 : i32
    %c0_i32_2 = arith.constant 0 : i32
    return %c0_i32, %c0_i32_0, %c0_i32_1 : i32, i32, i32
  }
  func.func @transform_6(%arg0: i32) -> (i32, i32) {
    %c0_i32 = arith.constant 0 : i32
    %c0_i32_0 = arith.constant 0 : i32
    %c0_i32_1 = arith.constant 0 : i32
    return %c0_i32, %c0_i32_0 : i32, i32
  }
  func.func @transform_7(%arg0: i32) -> (i32, i32, i32) {
    %c0_i32 = arith.constant 0 : i32
    %c0_i32_0 = arith.constant 0 : i32
    %c0_i32_1 = arith.constant 0 : i32
    return %arg0, %c0_i32, %c0_i32_0 : i32, i32, i32
  }
}

</mosaic_0001>

<bundles_post_ra>
// kernel: tpu_custom_call.1
= control target key start
LH: loop header
LB: loop body
LE: loop exit
PB: predicated region body
PF: predicated region fallthrough
CT: control target
= control target key end

     0   :  { %s3552_s0 = inlined_call_operand.vmem [shape: f32[2,8,32], index: 0, kind: input, shape index: {}]   ;;  %s3553_s1 = inlined_call_operand.vmem [shape: f32[2,8,32], index: 1, kind: input, shape index: {}]   ;;  %s3554_s2 = inlined_call_operand.vmem [shape: f32[4,32,8], index: 2, kind: input, shape index: {}]   ;;  %s3555_s3 = inlined_call_operand.vmem [shape: f32[4,32,8], index: 3, kind: input, shape index: {}]   ;;  %s3556_s4 = inlined_call_operand.vmem [shape: f32[4,32,8], index: 4, kind: input, shape index: {}]   ;;  %s3557_s5 = inlined_call_operand.vmem [shape: f32[4,8,32], index: 5, kind: input, shape index: {}]   ;;  %s3558_s6 = inlined_call_operand.vmem [shape: f32[1,32], index: 6, kind: input, shape index: {}]   ;;  %s3559_s7 = inlined_call_operand.hbm [shape: f32[2,8,32], index: 7, kind: output, shape index: {}]  }
   0x1   :  { %v120_v0 = vld [vmem:[%s3555_s3 + $0x18] sm:$0xff]  ;;  %v119_v2 = vld [vmem:[%s3555_s3 + $0x10] sm:$0xff]  ;;  %v118_v4 = vld [vmem:[%s3555_s3 + $0x8] sm:$0xff] }
   0x2   :  { %v34_v1 = vld [vmem:[%s3554_s2 + $0x18] sm:$0xff]  ;;  %2875 = vmatprep.subr.mxu1 %v120_v0  ;;  %v33_v3 = vld [vmem:[%s3554_s2 + $0x10] sm:$0xff]  ;;  %v32_v5 = vld [vmem:[%s3554_s2 + $0x8] sm:$0xff] }
   0x3   :  { %2864 = vmatprep.subr.mxu0 %v34_v1  ;;  %2876 = vmatpush3.msra.mxu1 %v120_v0  ;;  %v117_v6 = vld [vmem:[%s3555_s3] sm:$0xff] }
   0x4   :  { %2865 = vmatpush3.msra.mxu0 %v34_v1  ;;  %2877 = vmatprep.subr.mxu1 %v119_v2  ;;  %v31_v7 = vld [vmem:[%s3554_s2] sm:$0xff] }
   0x5   :  { %2866 = vmatprep.subr.mxu0 %v33_v3  ;;  %2878 = vmatpush3.msra.mxu1 %v119_v2 }
   0x6   :  { %2867 = vmatpush3.msra.mxu0 %v33_v3 }
   0x7   :  { %12 = vsyncpa [#allocation3], 0  ;;  %2879 = vmatprep.subr.mxu1 %v118_v4  ;;  %2868 = vmatprep.subr.mxu0 %v32_v5  ;;  %v3227_v8 = vld [vmem:[%s3553_s1] sm:$0xff]  ;;  %vm35_vm0 = vcmask 261120   ;;  %v3237_v10 = vld [vmem:[%s3553_s1 + $0x8] sm:$0xff]  ;;  %v3155_v12 = vmov 0.0  }
   0x8   :  { %2880 = vmatpush3.msra.mxu1 %v118_v4  ;;  %2869 = vmatpush3.msra.mxu0 %v32_v5  ;;  %v3232_v9 = vld [vmem:[%s3552_s0] sm:$0xff]  ;;  %v3242_v11 = vld [vmem:[%s3552_s0 + $0x8] sm:$0xff]  ;;  %vm3156_vm1 = vmmov 0   ;;  %vm281_vm2 = vcmask 64512   ;;  %v205_v17 = vld [vmem:[%s3556_s4 + $0x18] sm:$0xff]  ;;  %s3157_s12 = smov [#allocation2]  }
   0x9   :  { %2881 = vmatprep.subr.mxu1 %v117_v6  ;;  %2870 = vmatprep.subr.mxu0 %v31_v7  ;;  %v204_v18 = vld [vmem:[%s3556_s4 + $0x10] sm:$0xff]  ;;  %v203_v19 = vld [vmem:[%s3556_s4 + $0x8] sm:$0xff]  ;;  %v202_v20 = vld [vmem:[%s3556_s4] sm:$0xff]  ;;  %s2641_s13 = sshll.u32 %s3157_s12, 4  ;;  %s2642_s13 = int_to_ptr.vmem [resolvable:$true] %s2641_s13 }
   0xa   :  { %2882 = vmatpush3.msra.mxu1 %v117_v6  ;;  %2883 = vmatprep.mubr.msk.f32.mxu1 %vm35_vm0, %v3227_v8  ;;  %v2673_v40 = vld [vmem:[%s3555_s3 + $0x38] sm:$0xff]  ;;  %v2672_v47 = vld [vmem:[%s3555_s3 + $0x30] sm:$0xff]  ;;  %v2671_v49 = vld [vmem:[%s3555_s3 + $0x28] sm:$0xff]  ;;  %p3138_p1 = scmp.lt.s32.totalorder %s2642_s13, %s2642_s13 }
   0xb   :  { %2871 = vmatpush3.msra.mxu0 %v31_v7  ;;  %2872 = vmatprep.mubr.msk.f32.mxu0 %vm35_vm0, %v3232_v9  ;;  %v2667_v42 = vld [vmem:[%s3554_s2 + $0x38] sm:$0xff]  ;;  %v2666_v51 = vld [vmem:[%s3554_s2 + $0x30] sm:$0xff]  ;;  %v2670_v52 = vld [vmem:[%s3555_s3 + $0x20] sm:$0xff] }
   0xc   :  { %2884 = vmatmul.mubr.msk.f32.vlgmr.msra.gmra.mxu1 %vm35_vm0, %v3237_v10  ;;  %2873 = vmatmul.mubr.msk.f32.vlgmr.msra.gmra.mxu0 %vm35_vm0, %v3242_v11  ;;  %v2665_v53 = vld [vmem:[%s3554_s2 + $0x28] sm:$0xff]  ;;  %v2664_v54 = vld [vmem:[%s3554_s2 + $0x20] sm:$0xff]  ;;  %v2679_v63 = vld [vmem:[%s3556_s4 + $0x38] sm:$0xff] }
   0xd   :  { %2894 = vmatprep.mubr.msk.f32.mxu0 %vm35_vm0, %v3227_v8  ;;  %2897 = vmatprep.subr.mxu1 %v3155_v12  ;;  %v2678_v0 = vld [vmem:[%s3556_s4 + $0x30] sm:$0xff]  ;;  %v2677_v1 = vld [vmem:[%s3556_s4 + $0x28] sm:$0xff]  ;;  %v2676_v2 = vld [vmem:[%s3556_s4 + $0x20] sm:$0xff] }
   0xe   :  { %2899 = vmatprep.mubr.msk.f32.mxu1 %vm3156_vm1, %v3155_v12  ;;  %2886 = vmatprep.subr.mxu0 %v205_v17 }
   0xf   :  { %2887 = vmatpush3.msra.mxu0 %v205_v17 }
  0x10   :  { %2888 = vmatprep.subr.mxu0 %v204_v18 }
  0x11   :  { %2889 = vmatpush3.msra.mxu0 %v204_v18 }
  0x12   :  { %2890 = vmatprep.subr.mxu0 %v203_v19 }
  0x13   :  { %2891 = vmatpush3.msra.mxu0 %v203_v19 }
  0x14   :  { %2892 = vmatprep.subr.mxu0 %v202_v20 }
  0x15   :  { %2893 = vmatpush3.msra.mxu0 %v202_v20 }
  0x16   :  { %2895 = vmatmul.mubr.msk.f32.vlgmr.msra.gmra.mxu0 %vm35_vm0, %v3237_v10  ;;  %2907 = vmatprep.subr.mxu0 %v3155_v12 }
  0x17   :  { %2909 = vmatprep.mubr.msk.f32.mxu0 %vm3156_vm1, %v3155_v12 }
  0xcc   :  { %v2885_v13 = vpop.f32.mrf.mxu1  ;;  %v2874_v14 = vpop.f32.mrf.mxu0 }
  0xce   :  { %v193_v15 = vpop.f32.mrf.mxu1  ;;  %v108_v16 = vpop.f32.mrf.mxu0 }
  0xcf   :  { %2898 = vmatpush3.xpose.msk.msra.mxu1 %vm281_vm2, %v193_v15 }
  0xd0   :  { %2902 = vmatprep.subr.mxu1 %v3155_v12 }
  0xd2   :  { %2900 = vmatmul.mubr.msk.f32.vlgmr.msra.gmra.mxu1 %vm281_vm2, %v108_v16 }
  0xd3   :  { %2903 = vmatpush3.xpose.msk.msra.mxu1 %vm281_vm2, %v2885_v13  ;;  %2904 = vmatprep.mubr.msk.f32.mxu1 %vm3156_vm1, %v3155_v12 }
  0xd4   :  { %2912 = vmatprep.subr.mxu1 %v3155_v12 }
  0xd6   :  { %2905 = vmatmul.mubr.msk.f32.vlgmr.msra.gmra.mxu1 %vm281_vm2, %v2874_v14  ;;  %v2896_v39 = vpop.f32.mrf.mxu0 }
  0xd7   :  { %2914 = vmatprep.mubr.msk.f32.mxu1 %vm3156_vm1, %v3155_v12  ;;  %2913 = vmatpush3.msra.mxu1 %v2896_v39  ;;  %v2696_v39 = vld [vmem:[%s3554_s2 + $0x58] sm:$0xff] }
  0xd8   :  { %v272_v41 = vpop.f32.mrf.mxu0  ;;  %2928 = vmatprep.subr.mxu1 %v2673_v40 }
  0xd9   :  { %2908 = vmatpush3.msra.mxu0 %v272_v41 }
  0xda   :  { %2917 = vmatprep.subr.mxu0 %v2667_v42 }
 0x192   :  { %v354_v21 = vpop.f32.mrf.mxu1 }
 0x193   :  { %v434_v26 = vmul.f32 0.35355338, %v354_v21 }
 0x194   :  { %v2901_v22 = vpop.f32.mrf.mxu1 }
 0x195   :  { %v436_v28 = vsel %vm281_vm2, %v434_v26, -inf }
 0x196   :  { %v430_v23 = vpop.f32.mrf.mxu1 }
 0x197   :  { %v435_v24 = vmul.f32 0.35355338, %v430_v23 }
 0x198   :  { %v2906_v25 = vpop.f32.mrf.mxu1 }
 0x199   :  { %v439_v27 = vsel %vm281_vm2, %v435_v24, -inf }
 0x19a   :  { %440 = vmax.xlane.f32.xlu0 %v439_v27 }
 0x19e   :  { %437 = vmax.xlane.f32.xlu0 %v436_v28  ;;  %v604_v28 = vld [vmem:[%s3557_s5] sm:$0xff] }
 0x223   :  { %v441_v29 = vpop.xlane.xlu0 %440 }
 0x224   :  { %v443_v30 = vsub.f32 %v435_v24, %v441_v29 }
 0x226   :  { %v446_v31 = vmul.f32 1.442695, %v443_v30 }
 0x227   :  { %v438_v32 = vpop.xlane.xlu0 %437 }
 0x228   :  { %3101 = vpow2.f32 %v446_v31  ;;  %v442_v33 = vsub.f32 %v434_v26, %v438_v32 }
 0x22a   :  { %v444_v34 = vmul.f32 1.442695, %v442_v33 }
 0x22c   :  { %3103 = vpow2.f32 %v444_v34 }
 0x235   :  { %v3102_v35 = vpop.eup %3101 }
 0x236   :  { %v451_v36 = vsel %vm281_vm2, %v3102_v35, 0.0 }
 0x237   :  { %452 = vadd.xlane.f32.xlu1 %v451_v36  ;;  %v2688_v36 = vld [vmem:[%s3557_s5 + $0x8] sm:$0xff] }
 0x239   :  { %v3104_v37 = vpop.eup %3103 }
 0x23a   :  { %v448_v38 = vsel %vm281_vm2, %v3104_v37, 0.0 }
 0x23b   :  { %449 = vadd.xlane.f32.xlu1 %v448_v38  ;;  %v2700_v38 = vld [vmem:[%s3555_s3 + $0x48] sm:$0xff] }
 0x2c0   :  { %v453_v43 = vpop.xlane.xlu1 %452 }
 0x2c1   :  { %3105 = vrcp.f32 %v453_v43 }
 0x2c4   :  { %v450_v44 = vpop.xlane.xlu1 %449 }
 0x2c5   :  { %3107 = vrcp.f32 %v450_v44  ;;  %v2695_v44 = vld [vmem:[%s3554_s2 + $0x50] sm:$0xff] }
 0x2ce   :  { %v3106_v45 = vpop.eup %3105 }
 0x2cf   :  { %v457_v46 = vmul.f32 %v3106_v45, %v3102_v35  ;;  %v2702_v35 = vld [vmem:[%s3555_s3 + $0x58] sm:$0xff] }
 0x2d1   :  { %2915 = vmatmul.mubr.msk.f32.vlgmr.msra.gmra.mxu1 %vm281_vm2, %v457_v46  ;;  %v2694_v46 = vld [vmem:[%s3554_s2 + $0x48] sm:$0xff] }
 0x2d2   :  { %v3108_v48 = vpop.eup %3107  ;;  %2929 = vmatpush3.msra.mxu1 %v2673_v40  ;;  %2936 = vmatprep.mubr.msk.f32.mxu1 %vm35_vm0, %v3227_v8  ;;  %v2699_v40 = vld [vmem:[%s3555_s3 + $0x40] sm:$0xff] }
 0x2d3   :  { %2930 = vmatprep.subr.mxu1 %v2672_v47  ;;  %v456_v50 = vmul.f32 %v3108_v48, %v3104_v37  ;;  %v2701_v37 = vld [vmem:[%s3555_s3 + $0x50] sm:$0xff] }
 0x2d4   :  { %2931 = vmatpush3.msra.mxu1 %v2672_v47  ;;  %v2693_v47 = vld [vmem:[%s3554_s2 + $0x40] sm:$0xff] }
 0x2d5   :  { %2932 = vmatprep.subr.mxu1 %v2671_v49  ;;  %2910 = vmatmul.mubr.msk.f32.vlgmr.msra.gmra.mxu0 %vm281_vm2, %v456_v50 }
 0x2d6   :  { %2918 = vmatpush3.msra.mxu0 %v2667_v42  ;;  %2933 = vmatpush3.msra.mxu1 %v2671_v49 }
 0x2d7   :  { %2919 = vmatprep.subr.mxu0 %v2666_v51  ;;  %2934 = vmatprep.subr.mxu1 %v2670_v52 }
 0x2d8   :  { %2920 = vmatpush3.msra.mxu0 %v2666_v51  ;;  %2935 = vmatpush3.msra.mxu1 %v2670_v52 }
 0x2d9   :  { %2921 = vmatprep.subr.mxu0 %v2665_v53  ;;  %2937 = vmatmul.mubr.msk.f32.vlgmr.msra.gmra.mxu1 %vm35_vm0, %v3237_v10 }
 0x2da   :  { %2922 = vmatpush3.msra.mxu0 %v2665_v53  ;;  %2925 = vmatprep.mubr.msk.f32.mxu0 %vm35_vm0, %v3232_v9 }
 0x2db   :  { %2923 = vmatprep.subr.mxu0 %v2664_v54  ;;  %2950 = vmatprep.subr.mxu1 %v3155_v12 }
 0x2dc   :  { %2924 = vmatpush3.msra.mxu0 %v2664_v54  ;;  %2952 = vmatprep.mubr.msk.f32.mxu1 %vm3156_vm1, %v3155_v12 }
 0x2dd   :  { %2926 = vmatmul.mubr.msk.f32.vlgmr.msra.gmra.mxu0 %vm35_vm0, %v3242_v11  ;;  %2939 = vmatprep.subr.mxu0 %v2679_v63 }
 0x2de   :  { %2947 = vmatprep.mubr.msk.f32.mxu0 %vm35_vm0, %v3227_v8  ;;  %2940 = vmatpush3.msra.mxu0 %v2679_v63 }
 0x2df   :  { %2941 = vmatprep.subr.mxu0 %v2678_v0 }
 0x2e0   :  { %2942 = vmatpush3.msra.mxu0 %v2678_v0 }
 0x2e1   :  { %2943 = vmatprep.subr.mxu0 %v2677_v1 }
 0x2e2   :  { %2944 = vmatpush3.msra.mxu0 %v2677_v1 }
 0x2e3   :  { %2945 = vmatprep.subr.mxu0 %v2676_v2 }
 0x2e4   :  { %2946 = vmatpush3.msra.mxu0 %v2676_v2 }
 0x2e5   :  { %2948 = vmatmul.mubr.msk.f32.vlgmr.msra.gmra.mxu0 %vm35_vm0, %v3237_v10  ;;  %2960 = vmatprep.subr.mxu0 %v3155_v12 }
 0x2e6   :  { %2962 = vmatprep.mubr.msk.f32.mxu0 %vm3156_vm1, %v3155_v12 }
 0x391   :  { %v3327_v55 = vpop.f32.mrf.mxu1 }
 0x393   :  { %v2916_v56 = vpop.f32.mrf.mxu1 }
 0x394   :  { %v2708_v56 = vld [vmem:[%s3556_s4 + $0x58] sm:$0xff] }
 0x395   :  { %v3329_v57 = vpop.f32.mrf.mxu0 }
 0x397   :  { %v2911_v58 = vpop.f32.mrf.mxu0 }
 0x398   :  { %v2706_v58 = vld [vmem:[%s3556_s4 + $0x48] sm:$0xff] }
 0x399   :  { %v2938_v59 = vpop.f32.mrf.mxu1 }
 0x39b   :  { %v756_v60 = vpop.f32.mrf.mxu1 }
 0x39c   :  { %2951 = vmatpush3.xpose.msk.msra.mxu1 %vm281_vm2, %v756_v60 }
 0x39d   :  { %v2927_v61 = vpop.f32.mrf.mxu0  ;;  %2955 = vmatprep.subr.mxu1 %v3155_v12 }
 0x39f   :  { %v676_v62 = vpop.f32.mrf.mxu0 }
 0x3a0   :  { %2953 = vmatmul.mubr.msk.f32.vlgmr.msra.gmra.mxu1 %vm281_vm2, %v676_v62 }
 0x3a1   :  { %2956 = vmatpush3.xpose.msk.msra.mxu1 %vm281_vm2, %v2938_v59  ;;  %2957 = vmatprep.mubr.msk.f32.mxu1 %vm3156_vm1, %v3155_v12  ;;  %v2705_v59 = vld [vmem:[%s3556_s4 + $0x40] sm:$0xff] }
 0x3a2   :  { %2965 = vmatprep.subr.mxu1 %v3155_v12 }
 0x3a4   :  { %2958 = vmatmul.mubr.msk.f32.vlgmr.msra.gmra.mxu1 %vm281_vm2, %v2927_v61 }
 0x3a5   :  { %2967 = vmatprep.mubr.msk.f32.mxu1 %vm3156_vm1, %v3155_v12  ;;  %v2949_v26 = vpop.f32.mrf.mxu0 }
 0x3a6   :  { %2966 = vmatpush3.msra.mxu1 %v2949_v26 }
 0x3a7   :  { %v836_v27 = vpop.f32.mrf.mxu0  ;;  %2975 = vmatprep.subr.mxu1 %v604_v28 }
 0x3a8   :  { %2961 = vmatpush3.msra.mxu0 %v836_v27  ;;  %v2717_v27 = vld [vmem:[%s3557_s5 + $0x10] sm:$0xff] }
 0x3a9   :  { %2970 = vmatprep.subr.mxu0 %v2688_v36 }
 0x460   :  { %v917_v3 = vpop.f32.mrf.mxu1 }
 0x461   :  { %v997_v4 = vmul.f32 0.35355338, %v917_v3 }
 0x462   :  { %v2954_v5 = vpop.f32.mrf.mxu1 }
 0x463   :  { %v999_v6 = vsel %vm281_vm2, %v997_v4, -inf }
 0x464   :  { %1000 = vmax.xlane.f32.xlu0 %v999_v6  ;;  %v993_v7 = vpop.f32.mrf.mxu1 }
 0x465   :  { %v998_v13 = vmul.f32 0.35355338, %v993_v7 }
 0x466   :  { %v2959_v14 = vpop.f32.mrf.mxu1 }
 0x467   :  { %v1002_v15 = vsel %vm281_vm2, %v998_v13, -inf }
 0x468   :  { %1003 = vmax.xlane.f32.xlu1 %v1002_v15 }
 0x4ed   :  { %v1001_v16 = vpop.xlane.xlu0 %1000 }
 0x4ee   :  { %v1005_v17 = vsub.f32 %v997_v4, %v1001_v16 }
 0x4f0   :  { %v1007_v18 = vmul.f32 1.442695, %v1005_v17 }
 0x4f1   :  { %v1004_v19 = vpop.xlane.xlu1 %1003 }
 0x4f2   :  { %3109 = vpow2.f32 %v1007_v18  ;;  %v1006_v20 = vsub.f32 %v998_v13, %v1004_v19 }
 0x4f4   :  { %v1009_v21 = vmul.f32 1.442695, %v1006_v20 }
 0x4f6   :  { %3111 = vpow2.f32 %v1009_v21 }
 0x4ff   :  { %v3110_v22 = vpop.eup %3109 }
 0x500   :  { %v1011_v23 = vsel %vm281_vm2, %v3110_v22, 0.0 }
 0x501   :  { %1012 = vadd.xlane.f32.xlu0 %v1011_v23 }
 0x503   :  { %v3112_v24 = vpop.eup %3111 }
 0x504   :  { %v1014_v25 = vsel %vm281_vm2, %v3112_v24, 0.0 }
 0x505   :  { %1015 = vadd.xlane.f32.xlu1 %v1014_v25 }
 0x58a   :  { %v1013_v29 = vpop.xlane.xlu0 %1012 }
 0x58b   :  { %3113 = vrcp.f32 %v1013_v29  ;;  %v2723_v29 = vld [vmem:[%s3554_s2 + $0x78] sm:$0xff] }
 0x58e   :  { %v1016_v30 = vpop.xlane.xlu1 %1015 }
 0x58f   :  { %3115 = vrcp.f32 %v1016_v30  ;;  %v2721_v30 = vld [vmem:[%s3554_s2 + $0x68] sm:$0xff] }
 0x598   :  { %v3114_v31 = vpop.eup %3113 }
 0x599   :  { %v1019_v32 = vmul.f32 %v3114_v31, %v3110_v22  ;;  %v2720_v31 = vld [vmem:[%s3554_s2 + $0x60] sm:$0xff] }
 0x59b   :  { %2963 = vmatmul.mubr.msk.f32.vlgmr.msra.gmra.mxu0 %vm281_vm2, %v1019_v32 }
 0x59c   :  { %v3116_v33 = vpop.eup %3115  ;;  %2971 = vmatpush3.msra.mxu0 %v2688_v36 }
 0x59d   :  { %v1020_v34 = vmul.f32 %v3116_v33, %v3112_v24  ;;  %2980 = vmatprep.subr.mxu0 %v2696_v39 }
 0x59f   :  { %2968 = vmatmul.mubr.msk.f32.vlgmr.msra.gmra.mxu1 %vm281_vm2, %v1020_v34 }
 0x5a0   :  { %2977 = vmatprep.mubr.msk.f32.mxu1 %vm281_vm2, %v3329_v57  ;;  %2976 = vmatpush3.msra.mxu1 %v604_v28  ;;  %v2707_v57 = vld [vmem:[%s3556_s4 + $0x50] sm:$0xff]  ;;  %v2729_v28 = vld [vmem:[%s3555_s3 + $0x78] sm:$0xff] }
 0x5a1   :  { %2991 = vmatprep.subr.mxu1 %v2702_v35 }
 0x5a3   :  { %2978 = vmatmul.mubr.msk.f32.vlgmr.msra.gmra.mxu1 %vm281_vm2, %v3327_v55 }
 0x5a4   :  { %2992 = vmatpush3.msra.mxu1 %v2702_v35  ;;  %2999 = vmatprep.mubr.msk.f32.mxu1 %vm35_vm0, %v3227_v8  ;;  %v2728_v35 = vld [vmem:[%s3555_s3 + $0x70] sm:$0xff] }
 0x5a5   :  { %2993 = vmatprep.subr.mxu1 %v2701_v37 }
 0x5a6   :  { %2994 = vmatpush3.msra.mxu1 %v2701_v37  ;;  %v2726_v37 = vld [vmem:[%s3555_s3 + $0x60] sm:$0xff] }
 0x5a7   :  { %2995 = vmatprep.subr.mxu1 %v2700_v38 }
 0x5a8   :  { %2996 = vmatpush3.msra.mxu1 %v2700_v38 }
 0x5a9   :  { %2997 = vmatprep.subr.mxu1 %v2699_v40 }
 0x5aa   :  { %2998 = vmatpush3.msra.mxu1 %v2699_v40 }
 0x5ab   :  { %3000 = vmatmul.mubr.msk.f32.vlgmr.msra.gmra.mxu1 %vm35_vm0, %v3237_v10  ;;  %3013 = vmatprep.subr.mxu1 %v3155_v12 }
 0x5ac   :  { %3015 = vmatprep.mubr.msk.f32.mxu1 %vm3156_vm1, %v3155_v12 }
 0x65b   :  { %v1090_v41 = vpop.f32.mrf.mxu0 }
 0x65c   :  { %2972 = vmatprep.mubr.msk.f32.mxu0 %vm281_vm2, %v1090_v41 }
 0x65d   :  { %v2964_v42 = vpop.f32.mrf.mxu0 }
 0x65f   :  { %v1163_v43 = vpop.f32.mrf.mxu1 }
 0x660   :  { %2973 = vmatmul.mubr.msk.f32.vlgmr.msra.gmra.mxu0 %vm281_vm2, %v1163_v43 }
 0x661   :  { %2981 = vmatpush3.msra.mxu0 %v2696_v39  ;;  %v2969_v45 = vpop.f32.mrf.mxu1  ;;  %2988 = vmatprep.mubr.msk.f32.mxu0 %vm35_vm0, %v3232_v9 }
 0x662   :  { %2982 = vmatprep.subr.mxu0 %v2695_v44 }
 0x663   :  { %2983 = vmatpush3.msra.mxu0 %v2695_v44  ;;  %v3413_v48 = vpop.f32.mrf.mxu1 }
 0x664   :  { %2984 = vmatprep.subr.mxu0 %v2694_v46 }
 0x665   :  { %2985 = vmatpush3.msra.mxu0 %v2694_v46  ;;  %v3415_v49 = vpop.f32.mrf.mxu1 }
 0x666   :  { %2986 = vmatprep.subr.mxu0 %v2693_v47 }
 0x667   :  { %2987 = vmatpush3.msra.mxu0 %v2693_v47  ;;  %v2735_v47 = vld [vmem:[%s3556_s4 + $0x78] sm:$0xff] }
 0x668   :  { %2989 = vmatmul.mubr.msk.f32.vlgmr.msra.gmra.mxu0 %vm35_vm0, %v3242_v11  ;;  %3002 = vmatprep.subr.mxu0 %v2708_v56 }
 0x669   :  { %3010 = vmatprep.mubr.msk.f32.mxu0 %vm35_vm0, %v3227_v8  ;;  %3003 = vmatpush3.msra.mxu0 %v2708_v56 }
 0x66a   :  { %3004 = vmatprep.subr.mxu0 %v2707_v57 }
 0x66b   :  { %v3001_v50 = vpop.f32.mrf.mxu1  ;;  %3005 = vmatpush3.msra.mxu0 %v2707_v57 }
 0x66c   :  { %3006 = vmatprep.subr.mxu0 %v2706_v58 }
 0x66d   :  { %v1482_v51 = vpop.f32.mrf.mxu1  ;;  %3007 = vmatpush3.msra.mxu0 %v2706_v58 }
 0x66e   :  { %3014 = vmatpush3.xpose.msk.msra.mxu1 %vm281_vm2, %v1482_v51  ;;  %3008 = vmatprep.subr.mxu0 %v2705_v59 }
 0x66f   :  { %3018 = vmatprep.subr.mxu1 %v3155_v12  ;;  %3009 = vmatpush3.msra.mxu0 %v2705_v59 }
 0x670   :  { %3011 = vmatmul.mubr.msk.f32.vlgmr.msra.gmra.mxu0 %vm35_vm0, %v3237_v10  ;;  %3023 = vmatprep.subr.mxu0 %v3155_v12 }
 0x671   :  { %3025 = vmatprep.mubr.msk.f32.mxu0 %vm3156_vm1, %v3155_v12 }
 0x720   :  { %v3419_v52 = vpop.f32.mrf.mxu0 }
 0x722   :  { %v3421_v53 = vpop.f32.mrf.mxu0 }
 0x723   :  { %v1323_v39 = vadd.f32 %v3415_v49, %v3421_v53  ;;  %v2733_v49 = vld [vmem:[%s3556_s4 + $0x68] sm:$0xff] }
 0x728   :  { %v2990_v54 = vpop.f32.mrf.mxu0 }
 0x72a   :  { %v1402_v55 = vpop.f32.mrf.mxu0 }
 0x72b   :  { %3016 = vmatmul.mubr.msk.f32.vlgmr.msra.gmra.mxu1 %vm281_vm2, %v1402_v55 }
 0x72c   :  { %3019 = vmatpush3.xpose.msk.msra.mxu1 %vm281_vm2, %v3001_v50  ;;  %3020 = vmatprep.mubr.msk.f32.mxu1 %vm3156_vm1, %v3155_v12  ;;  %v2732_v50 = vld [vmem:[%s3556_s4 + $0x60] sm:$0xff] }
 0x72d   :  { %3028 = vmatprep.subr.mxu1 %v3155_v12 }
 0x72f   :  { %3021 = vmatmul.mubr.msk.f32.vlgmr.msra.gmra.mxu1 %vm281_vm2, %v2990_v54 }
 0x730   :  { %3030 = vmatprep.mubr.msk.f32.mxu1 %vm3156_vm1, %v3155_v12  ;;  %v3012_v19 = vpop.f32.mrf.mxu0 }
 0x731   :  { %3029 = vmatpush3.msra.mxu1 %v3012_v19 }
 0x732   :  { %v1562_v20 = vpop.f32.mrf.mxu0  ;;  %3038 = vmatprep.subr.mxu1 %v2723_v29 }
 0x733   :  { %3024 = vmatpush3.msra.mxu0 %v1562_v20 }
 0x734   :  { %3033 = vmatprep.subr.mxu0 %v2717_v27 }
 0x7eb   :  { %v1643_v60 = vpop.f32.mrf.mxu1 }
 0x7ec   :  { %v1723_v61 = vmul.f32 0.35355338, %v1643_v60 }
 0x7ed   :  { %v3017_v62 = vpop.f32.mrf.mxu1 }
 0x7ee   :  { %v1725_v63 = vsel %vm281_vm2, %v1723_v61, -inf }
 0x7ef   :  { %1726 = vmax.xlane.f32.xlu0 %v1725_v63  ;;  %v1719_v0 = vpop.f32.mrf.mxu1 }
 0x7f0   :  { %v1724_v1 = vmul.f32 0.35355338, %v1719_v0 }
 0x7f1   :  { %v3022_v2 = vpop.f32.mrf.mxu1 }
 0x7f2   :  { %v1728_v3 = vsel %vm281_vm2, %v1724_v1, -inf }
 0x7f3   :  { %1729 = vmax.xlane.f32.xlu1 %v1728_v3 }
 0x878   :  { %v1727_v4 = vpop.xlane.xlu0 %1726 }
 0x879   :  { %v1731_v5 = vsub.f32 %v1723_v61, %v1727_v4 }
 0x87b   :  { %v1733_v6 = vmul.f32 1.442695, %v1731_v5 }
 0x87c   :  { %v1730_v7 = vpop.xlane.xlu1 %1729 }
 0x87d   :  { %3117 = vpow2.f32 %v1733_v6  ;;  %v1732_v13 = vsub.f32 %v1724_v1, %v1730_v7 }
 0x87f   :  { %v1735_v14 = vmul.f32 1.442695, %v1732_v13 }
 0x881   :  { %3119 = vpow2.f32 %v1735_v14 }
 0x88a   :  { %v3118_v15 = vpop.eup %3117 }
 0x88b   :  { %v1737_v16 = vsel %vm281_vm2, %v3118_v15, 0.0 }
 0x88c   :  { %1738 = vadd.xlane.f32.xlu0 %v1737_v16  ;;  %v2744_v16 = vld [vmem:[%s3557_s5 + $0x18] sm:$0xff]  ;;  %s3133_s5 = scalar_lea.vmem %s2642_s13, 256 }
 0x88d   :  { %p3134_p0 = scmp.ne.s32.totalorder %s2642_s13, %s3133_s5  ;;  %p3139_p2 = scmp.lt.s32.totalorder %s3133_s5, %s3133_s5 }
 0x88e   :  { %v3120_v17 = vpop.eup %3119 }
 0x88f   :  { %v1740_v18 = vsel %vm281_vm2, %v3120_v17, 0.0  ;;  %p3140_p3 = por %p3139_p2, %p3138_p1 }
 0x890   :  { %1741 = vadd.xlane.f32.xlu1 %v1740_v18 }
 0x891   :  { %p3141_p4 = pnand %p3140_p3, %p3134_p0 }
 0x915   :  { %v1739_v21 = vpop.xlane.xlu0 %1738 }
 0x916   :  { %3121 = vrcp.f32 %v1739_v21 }
 0x919   :  { %v1742_v22 = vpop.xlane.xlu1 %1741 }
 0x91a   :  { %3123 = vrcp.f32 %v1742_v22  ;;  %v2747_v22 = vld [vmem:[%s3558_s6] ss:$0 sm:$0xff] }
 0x923   :  { %v3122_v23 = vpop.eup %3121 }
 0x924   :  { %v1745_v24 = vmul.f32 %v3122_v23, %v3118_v15 }
 0x926   :  { %3026 = vmatmul.mubr.msk.f32.vlgmr.msra.gmra.mxu0 %vm281_vm2, %v1745_v24 }
 0x927   :  { %v3124_v25 = vpop.eup %3123  ;;  %3034 = vmatpush3.msra.mxu0 %v2717_v27 }
 0x928   :  { %v1746_v26 = vmul.f32 %v3124_v25, %v3120_v17  ;;  %3049 = vmatprep.subr.mxu0 %v2729_v28 }
 0x92a   :  { %3031 = vmatmul.mubr.msk.f32.vlgmr.msra.gmra.mxu1 %vm281_vm2, %v1746_v26 }
 0x92b   :  { %3046 = vmatprep.mubr.msk.f32.mxu1 %vm35_vm0, %v3232_v9  ;;  %3039 = vmatpush3.msra.mxu1 %v2723_v29  ;;  %v2722_v9 = vld [vmem:[%s3554_s2 + $0x70] sm:$0xff] }
 0x92c   :  { %3040 = vmatprep.subr.mxu1 %v2722_v9 }
 0x92d   :  { %3041 = vmatpush3.msra.mxu1 %v2722_v9 }
 0x92e   :  { %3042 = vmatprep.subr.mxu1 %v2721_v30 }
 0x92f   :  { %3043 = vmatpush3.msra.mxu1 %v2721_v30 }
 0x930   :  { %3044 = vmatprep.subr.mxu1 %v2720_v31 }
 0x931   :  { %3045 = vmatpush3.msra.mxu1 %v2720_v31 }
 0x932   :  { %3047 = vmatmul.mubr.msk.f32.vlgmr.msra.gmra.mxu1 %vm35_vm0, %v3242_v11  ;;  %v2727_v11 = vld [vmem:[%s3555_s3 + $0x68] sm:$0xff]  ;;  %3060 = vmatprep.subr.mxu1 %v2735_v47 }
 0x933   :  { %3068 = vmatprep.mubr.msk.f32.mxu1 %vm35_vm0, %v3227_v8  ;;  %3061 = vmatpush3.msra.mxu1 %v2735_v47 }
 0x9e6   :  { %v1816_v32 = vpop.f32.mrf.mxu0 }
 0x9e7   :  { %3035 = vmatprep.mubr.msk.f32.mxu0 %vm281_vm2, %v1816_v32 }
 0x9e8   :  { %v3027_v33 = vpop.f32.mrf.mxu0 }
 0x9ea   :  { %v1889_v34 = vpop.f32.mrf.mxu1 }
 0x9eb   :  { %3036 = vmatmul.mubr.msk.f32.vlgmr.msra.gmra.mxu0 %vm281_vm2, %v1889_v34 }
 0x9ec   :  { %3050 = vmatpush3.msra.mxu0 %v2729_v28  ;;  %v3032_v36 = vpop.f32.mrf.mxu1  ;;  %3057 = vmatprep.mubr.msk.f32.mxu0 %vm35_vm0, %v3227_v8  ;;  %v1328_v8 = vadd.f32 %v3413_v48, %v3419_v52  ;;  %v2734_v48 = vld [vmem:[%s3556_s4 + $0x70] sm:$0xff] }
 0x9ed   :  { %3051 = vmatprep.subr.mxu0 %v2728_v35  ;;  %3062 = vmatprep.subr.mxu1 %v2734_v48 }
 0x9ee   :  { %3052 = vmatpush3.msra.mxu0 %v2728_v35  ;;  %3063 = vmatpush3.msra.mxu1 %v2734_v48 }
 0x9ef   :  { %3053 = vmatprep.subr.mxu0 %v2727_v11  ;;  %3064 = vmatprep.subr.mxu1 %v2733_v49 }
 0x9f0   :  { %3054 = vmatpush3.msra.mxu0 %v2727_v11  ;;  %3065 = vmatpush3.msra.mxu1 %v2733_v49 }
 0x9f1   :  { %3055 = vmatprep.subr.mxu0 %v2726_v37  ;;  %3066 = vmatprep.subr.mxu1 %v2732_v50 }
 0x9f2   :  { %3056 = vmatpush3.msra.mxu0 %v2726_v37  ;;  %v3048_v44 = vpop.f32.mrf.mxu1  ;;  %3067 = vmatpush3.msra.mxu1 %v2732_v50 }
 0x9f3   :  { %3058 = vmatmul.mubr.msk.f32.vlgmr.msra.gmra.mxu0 %vm35_vm0, %v3237_v10  ;;  %3071 = vmatprep.subr.mxu0 %v3155_v12 }
 0x9f4   :  { %3073 = vmatprep.mubr.msk.f32.mxu0 %vm3156_vm1, %v3155_v12  ;;  %v2049_v46 = vpop.f32.mrf.mxu1  ;;  %3069 = vmatmul.mubr.msk.f32.vlgmr.msra.gmra.mxu1 %vm35_vm0, %v3237_v10 }
 0x9f5   :  { %3081 = vmatprep.subr.mxu1 %v3155_v12  ;;  %3083 = vmatprep.mubr.msk.f32.mxu1 %vm3156_vm1, %v3155_v12 }
 0xaab   :  { %v3037_v38 = vpop.f32.mrf.mxu0 }
 0xaac   :  { %v3500_v40 = vadd.f32 %v3037_v38, %v1328_v8 }
 0xaad   :  { %v1967_v41 = vpop.f32.mrf.mxu0 }
 0xaae   :  { %v3502_v42 = vadd.f32 %v1967_v41, %v1323_v39 }
 0xab3   :  { %v3059_v43 = vpop.f32.mrf.mxu0 }
 0xab4   :  { %v3070_v3 = vpop.f32.mrf.mxu1 }
 0xab5   :  { %v2129_v45 = vpop.f32.mrf.mxu0 }
 0xab6   :  { %3072 = vmatpush3.xpose.msk.msra.mxu0 %vm281_vm2, %v2129_v45  ;;  %v2209_v4 = vpop.f32.mrf.mxu1 }
 0xab7   :  { %3076 = vmatprep.subr.mxu0 %v3155_v12  ;;  %3082 = vmatpush3.msra.mxu1 %v2209_v4 }
 0xab8   :  { %3091 = vmatprep.subr.mxu1 %v2744_v16 }
 0xab9   :  { %3074 = vmatmul.mubr.msk.f32.vlgmr.msra.gmra.mxu0 %vm281_vm2, %v2049_v46 }
 0xaba   :  { %3077 = vmatpush3.xpose.msk.msra.mxu0 %vm281_vm2, %v3059_v43  ;;  %3078 = vmatprep.mubr.msk.f32.mxu0 %vm3156_vm1, %v3155_v12 }
 0xabb   :  { %3086 = vmatprep.subr.mxu0 %v3155_v12 }
 0xabd   :  { %3079 = vmatmul.mubr.msk.f32.vlgmr.msra.gmra.mxu0 %vm281_vm2, %v3048_v44 }
 0xabe   :  { %3088 = vmatprep.mubr.msk.f32.mxu0 %vm3156_vm1, %v3155_v12  ;;  %3087 = vmatpush3.msra.mxu0 %v3070_v3 }
 0xb79   :  { %v2290_v51 = vpop.f32.mrf.mxu0 }
 0xb7a   :  { %v2370_v52 = vmul.f32 0.35355338, %v2290_v51 }
 0xb7b   :  { %v3075_v53 = vpop.f32.mrf.mxu0 }
 0xb7c   :  { %v2372_v54 = vsel %vm281_vm2, %v2370_v52, -inf }
 0xb7d   :  { %2373 = vmax.xlane.f32.xlu0 %v2372_v54  ;;  %v2366_v55 = vpop.f32.mrf.mxu0 }
 0xb7e   :  { %v2371_v56 = vmul.f32 0.35355338, %v2366_v55 }
 0xb7f   :  { %v3080_v57 = vpop.f32.mrf.mxu0 }
 0xb80   :  { %v2375_v58 = vsel %vm281_vm2, %v2371_v56, -inf }
 0xb81   :  { %2376 = vmax.xlane.f32.xlu1 %v2375_v58 }
 0xc06   :  { %v2374_v59 = vpop.xlane.xlu0 %2373 }
 0xc07   :  { %v2378_v60 = vsub.f32 %v2370_v52, %v2374_v59 }
 0xc09   :  { %v2380_v10 = vmul.f32 1.442695, %v2378_v60 }
 0xc0a   :  { %v2377_v61 = vpop.xlane.xlu1 %2376 }
 0xc0b   :  { %3125 = vpow2.f32 %v2380_v10  ;;  %v2379_v62 = vsub.f32 %v2371_v56, %v2377_v61 }
 0xc0d   :  { %v2382_v63 = vmul.f32 1.442695, %v2379_v62 }
 0xc0f   :  { %3127 = vpow2.f32 %v2382_v63 }
 0xc18   :  { %v3126_v12 = vpop.eup %3125 }
 0xc19   :  { %v2384_v0 = vsel %vm281_vm2, %v3126_v12, 0.0 }
 0xc1a   :  { %2385 = vadd.xlane.f32.xlu0 %v2384_v0 }
 0xc1c   :  { %v3128_v1 = vpop.eup %3127 }
 0xc1d   :  { %v2387_v2 = vsel %vm281_vm2, %v3128_v1, 0.0 }
 0xc1e   :  { %2388 = vadd.xlane.f32.xlu1 %v2387_v2 }
 0xca3   :  { %v2386_v5 = vpop.xlane.xlu0 %2385 }
 0xca4   :  { %3129 = vrcp.f32 %v2386_v5 }
 0xca7   :  { %v2389_v6 = vpop.xlane.xlu1 %2388 }
 0xca8   :  { %3131 = vrcp.f32 %v2389_v6 }
 0xcb1   :  { %v3130_v7 = vpop.eup %3129 }
 0xcb2   :  { %v2392_v13 = vmul.f32 %v3130_v7, %v3126_v12 }
 0xcb4   :  { %3084 = vmatmul.mubr.msk.f32.vlgmr.msra.gmra.mxu1 %vm281_vm2, %v2392_v13 }
 0xcb5   :  { %v3132_v14 = vpop.eup %3131  ;;  %3092 = vmatpush3.msra.mxu1 %v2744_v16 }
 0xcb6   :  { %v2393_v15 = vmul.f32 %v3132_v14, %v3128_v1 }
 0xcb8   :  { %3089 = vmatmul.mubr.msk.f32.vlgmr.msra.gmra.mxu0 %vm281_vm2, %v2393_v15 }
 0xd74   :  { %v2463_v17 = vpop.f32.mrf.mxu1 }
 0xd75   :  { %3093 = vmatprep.mubr.msk.f32.mxu1 %vm281_vm2, %v2463_v17 }
 0xd76   :  { %v3085_v18 = vpop.f32.mrf.mxu1 }
 0xd78   :  { %v2536_v19 = vpop.f32.mrf.mxu0 }
 0xd79   :  { %3094 = vmatmul.mubr.msk.f32.vlgmr.msra.gmra.mxu1 %vm281_vm2, %v2536_v19 }
 0xd7a   :  { %v3090_v20 = vpop.f32.mrf.mxu0 }
 0xe39   :  { %v3095_v21 = vpop.f32.mrf.mxu1 }
 0xe3a   :  { %v2624_v23 = vadd.f32 %v3095_v21, %v3500_v40 }
 0xe3b   :  { %v2614_v24 = vpop.f32.mrf.mxu1 }
 0xe3c   :  { %v2633_v25 = vadd.f32 %v2747_v22, %v2624_v23  ;;  %v2623_v26 = vadd.f32 %v2614_v24, %v3502_v42 }
 0xe3e   :  { %2635 = vst.msk [vmem:[#allocation2 + $0x8] sm:$0xff] %vm35_vm0, %v2633_v25  ;;  %v2632_v27 = vadd.f32 %v2747_v22, %v2623_v26 }
 0xe40   :  { %2634 = vst.msk [vmem:[#allocation2] sm:$0xff] %vm35_vm0, %v2632_v27 }
 0xe41   :  { %3144 = shalt.err (!%p3141_p4)
}
 0xe42   :  { %s3158_s6 = smov 128   ;;  %s3159_s14 = smov 8  }
 0xe43   :  { %2647 = dma.vmem_to_hbm [thread:$0]  %s2642_s13, 256, %s3559_s7, [#allocation3], %s3158_s6, %s3158_s6, %s3159_s14  }
 0xe44   :  { %3153 = dma.done.wait [#allocation3], 256  }
 0xe45   :  { %3154 = vsyncadd [#allocation3], 4294967040 }
 0xe46   :  { %2651 = vsyncpa [#allocation3], 1 }

</bundles_post_ra>
